<compile_context>
chip_gen: v7x
topology: tpu7x:2x2x1
jax: 0.10.0
libtpu: 0.0.40
codegen_flags: <defaults>
</compile_context>

<pallas_src>
import functools

import jax
import jax.numpy as jnp
from jax.experimental import pallas as pl
from jax.experimental.pallas import tpu as pltpu


def _round_up(x, m):
    return -(-x // m) * m


# ----------------------------- Pallas kernel ---------------------------------
def _seq_embedder_kernel(patches_ref, w_ref, b_ref, clspos_ref, posrest_ref, out_ref,
                         *, bt, num_patches, maxpool_size):
    # patches_ref: (1, maxpool_size*bt*num_patches, kc_pad) bf16, rows ordered
    #              (pool_phase m, batch b_local, patch p)
    # w_ref:       (kc_pad, dim_pad) bf16 (zero-padded, lane-dense)
    # b_ref:       (1, dim_pad)      f32
    # clspos_ref:  (1, dim_pad)      f32  (= cls_token + pos_emb[0], batch-invariant)
    # posrest_ref: (num_patches, dim_pad) f32 (= pos_emb[1:])
    # out_ref:     (bt, num_patches + 1, dim_pad) f32
    dim_pad = out_ref.shape[-1]

    # Conv1d for bt batch elements as ONE lane-dense MXU matmul (f32 accumulation).
    acc = jnp.dot(patches_ref[0], w_ref[...], preferred_element_type=jnp.float32)

    # MaxPool1d(maxpool_size): pure-VPU maximum tree over contiguous, sublane-aligned slabs.
    rows = bt * num_patches
    pooled = acc[0:rows, :]
    for m in range(1, maxpool_size):
        pooled = jnp.maximum(pooled, acc[m * rows:(m + 1) * rows, :])

    # Bias + ReLU after pooling (max is monotone, bias per-channel -> commutes; mp x cheaper).
    pooled = jnp.maximum(pooled + b_ref[...], 0.0)

    # Two lane-dense slab stores (no per-batch loop): cls row, then all patch rows at once.
    out_ref[:, 0:1, :] = jnp.broadcast_to(
        clspos_ref[...].reshape(1, 1, dim_pad), (bt, 1, dim_pad)).astype(out_ref.dtype)
    out_ref[:, 1:, :] = (pooled.reshape(bt, num_patches, dim_pad)
                         + posrest_ref[...][None, :, :]).astype(out_ref.dtype)


# --------------------------- HW-aware tiling helpers ---------------------------
def _tensorcores_per_chip():
    # v4 / v5p / v7x expose two TensorCores to a single Pallas grid; v5e/v6e have one.
    try:
        kind = jax.devices()[0].device_kind.lower()
    except Exception:
        return 1
    return 2 if any(t in kind for t in ("v7", "v4", "v5p")) else 1


def _vmem_capacity_bytes():
    try:
        return int(pltpu.get_tpu_info().vmem_capacity_bytes)
    except Exception:
        return 64 << 20          # conservative fallback (v7x-sized)


def _block_vmem_bytes(bt, num_patches, maxpool_size, kc_pad, dim_pad):
    """Per-step VMEM footprint with lane/sublane padding and double-buffering."""
    m_rows = maxpool_size * bt * num_patches
    patches = 2 * m_rows * kc_pad * 2                               # bf16 input, x2 buffers
    out = 2 * bt * _round_up(num_patches + 1, 8) * dim_pad * 4      # f32 output, x2 buffers
    weights = 2 * _round_up(kc_pad, 8) * dim_pad * 2                # bf16 weights, x2 buffers
    consts = (2 * 8 + _round_up(num_patches, 8)) * dim_pad * 4 * 2  # bias/clspos/pos, x2
    live = m_rows * dim_pad * 4 + bt * num_patches * dim_pad * 4    # matmul acc + pooled temps
    return patches + out + weights + consts + live


def _choose_batch_tile(B, num_patches, maxpool_size, kc_pad, dim_pad, cores, budget):
    # Only force >= 2 grid steps on 2-TC parts; on 1-TC parts fold as much batch as fits.
    bt_max = B if cores < 2 else max(1, -(-B // 2))
    bt = 1
    for cand in range(1, bt_max + 1):
        if _block_vmem_bytes(cand, num_patches, maxpool_size, kc_pad, dim_pad) <= budget:
            bt = cand
    # Prefer sublane-aligned pooling slabs (bt*num_patches % 8 == 0) when possible.
    if (bt * num_patches) % 8 != 0:
        for cand in range(bt, 0, -1):
            if (cand * num_patches) % 8 == 0:
                bt = cand
                break
    return bt


# ------------------------------- Wrapper --------------------------------------
def seq_embedder_forward(seq, params, *, cnn_kernel_size, stride, token_size):
    """seq: (B, emb_dim, seq_len) float32, PyTorch NCL convention.

    Returns (x, ps) where x: (B, num_patches + 1, dim) and ps mimics the einops
    `pack` structure [(), (num_patches,)].
    """
    B, emb_dim, seq_len = seq.shape
    K = cnn_kernel_size
    assert seq_len % token_size == 0, "seq_len must be divisible by token_size"
    assert token_size % stride == 0, "token_size must be divisible by stride"
    pad = (K - 1) // 2
    L_out = (seq_len + 2 * pad - K) // stride + 1
    maxpool_size = token_size // stride
    num_patches = seq_len // token_size
    assert num_patches * maxpool_size == L_out, "pooling does not tile the conv output"

    w = params["conv_w"]          # (dim, emb_dim, K)  -- PyTorch Conv1d layout
    b = params["conv_b"]          # (dim,)
    cls_token = params["cls"]     # (dim,)
    pos_emb = params["pos"]       # (1, num_patches + 1, dim)
    dim = w.shape[0]
    kc = K * emb_dim

    # Lane-dense padding: out-channels (MXU N / store lanes) and contraction dim.
    dim_pad = _round_up(dim, 128)
    kc_pad = 128 if kc <= 128 else _round_up(kc, 8)

    cores = _tensorcores_per_chip()
    vmem_cap = _vmem_capacity_bytes()
    budget = min(24 << 20, vmem_cap // 4)
    bt = _choose_batch_tile(B, num_patches, maxpool_size, kc_pad, dim_pad, cores, budget)
    num_steps = -(-B // bt)
    B_pad = num_steps * bt        # non-divisor batch handled by padding (sliced off below)

    # ---- glue: im2col (gather/pad/reshape only; all compute lives in the kernel) ----
    x_blc = jnp.transpose(seq, (0, 2, 1))                        # (B, L, C_in)
    x_pad = jnp.pad(x_blc, ((0, 0), (pad, pad), (0, 0)))
    taps = [x_pad[:, k:k + (L_out - 1) * stride + 1:stride, :] for k in range(K)]
    patches = jnp.stack(taps, axis=2).reshape(B, L_out, kc)      # rows ordered by conv pos l
    patches = jnp.pad(patches, ((0, B_pad - B), (0, 0), (0, kc_pad - kc)))

    # Reorder rows: l = p*maxpool_size + m -> per-step (m, b_local, p), so the in-kernel
    # maxpool is a max over contiguous slabs and pooled rows come out ordered (b_local, p).
    patches = patches.reshape(B_pad, num_patches, maxpool_size, kc_pad)
    patches = jnp.transpose(patches, (0, 2, 1, 3))               # (B_pad, mp, np, kc_pad)
    patches = patches.reshape(num_steps, bt, maxpool_size, num_patches, kc_pad)
    patches = jnp.transpose(patches, (0, 2, 1, 3, 4))            # (steps, mp, bt, np, kc_pad)
    patches = patches.reshape(num_steps, maxpool_size * bt * num_patches, kc_pad)
    patches = patches.astype(jnp.bfloat16)

    w_flat = jnp.transpose(w, (2, 1, 0)).reshape(kc, dim)
    w_flat = jnp.pad(w_flat, ((0, kc_pad - kc), (0, dim_pad - dim))).astype(jnp.bfloat16)
    b2d = jnp.pad(b.reshape(1, dim), ((0, 0), (0, dim_pad - dim))).astype(jnp.float32)
    clspos = jnp.pad((cls_token + pos_emb[0, 0]).reshape(1, dim),
                     ((0, 0), (0, dim_pad - dim))).astype(jnp.float32)     # hoisted, batch-invariant
    pos_rest = jnp.pad(pos_emb[0, 1:], ((0, 0), (0, dim_pad - dim))).astype(jnp.float32)

    m_rows = maxpool_size * bt * num_patches
    kernel = functools.partial(_seq_embedder_kernel, bt=bt,
                               num_patches=num_patches, maxpool_size=maxpool_size)
    vmem_limit = int(min(vmem_cap * 3 // 4,
                         max(32 << 20,
                             _block_vmem_bytes(bt, num_patches, maxpool_size, kc_pad, dim_pad)
                             + (8 << 20))))

    out = pl.pallas_call(
        kernel,
        out_shape=jax.ShapeDtypeStruct((B_pad, num_patches + 1, dim_pad), jnp.float32),
        grid_spec=pltpu.PrefetchScalarGridSpec(
            num_scalar_prefetch=0,
            grid=(num_steps,),
            in_specs=[
                pl.BlockSpec((1, m_rows, kc_pad), lambda s: (s, 0, 0)),
                pl.BlockSpec((kc_pad, dim_pad), lambda s: (0, 0)),
                pl.BlockSpec((1, dim_pad), lambda s: (0, 0)),
                pl.BlockSpec((1, dim_pad), lambda s: (0, 0)),
                pl.BlockSpec((num_patches, dim_pad), lambda s: (0, 0)),
            ],
            out_specs=pl.BlockSpec((bt, num_patches + 1, dim_pad), lambda s: (s, 0, 0)),
        ),
        compiler_params=pltpu.CompilerParams(
            dimension_semantics=("parallel",),
            vmem_limit_bytes=vmem_limit),
    )(patches, w_flat, b2d, clspos, pos_rest)

    # Slice off the lane padding and the batch padding (wrapper-side, keeps kernel dense).
    x = out[:B, :, :dim]
    ps = [(), (num_patches,)]    # einops `pack` shape structure for [cls_tokens, x]
    return x, ps


# ------------------------------ Reference -------------------------------------
def _reference(seq, params, *, cnn_kernel_size, stride, token_size):
    """Pure-JAX reference mirroring the kernel's bf16 matmul operands (f32 accumulation)."""
    B, emb_dim, seq_len = seq.shape
    K = cnn_kernel_size
    pad = (K - 1) // 2
    L_out = (seq_len + 2 * pad - K) // stride + 1
    maxpool_size = token_size // stride
    num_patches = seq_len // token_size
    dim = params["conv_w"].shape[0]

    x_blc = jnp.transpose(seq, (0, 2, 1))
    x_pad = jnp.pad(x_blc, ((0, 0), (pad, pad), (0, 0)))
    taps = [x_pad[:, k:k + (L_out - 1) * stride + 1:stride, :] for k in range(K)]
    patches = jnp.stack(taps, axis=2).reshape(B, L_out, K * emb_dim)
    w_flat = jnp.transpose(params["conv_w"], (2, 1, 0)).reshape(K * emb_dim, dim)
    conv = jnp.einsum("blk,kd->bld",
                      patches.astype(jnp.bfloat16), w_flat.astype(jnp.bfloat16),
                      preferred_element_type=jnp.float32)
    conv = jnp.maximum(conv + params["conv_b"][None, None, :], 0.0)
    pooled = conv.reshape(B, num_patches, maxpool_size, dim).max(axis=2)
    cls = jnp.broadcast_to(params["cls"][None, None, :], (B, 1, dim))
    x = jnp.concatenate([cls, pooled], axis=1)
    return x + params["pos"][:, :num_patches + 1]


# --------------------------------- Main ----------------------------------------
if __name__ == "__main__":
    # Small shapes consistent with SeqEmbedder(dim, cnn_kernel_size, stride, emb_dim,
    #                                          seq_len, token_size).
    B = 2
    emb_dim = 8          # conv in-channels
    dim = 32             # conv out-channels / embedding dim
    seq_len = 64
    token_size = 8
    stride = 2
    cnn_kernel_size = 3
    num_patches = seq_len // token_size

    key = jax.random.PRNGKey(0)
    k_seq, k_w, k_b, k_cls, k_pos = jax.random.split(key, 5)

    seq = jax.random.normal(k_seq, (B, emb_dim, seq_len), dtype=jnp.float32)

    fan_in = emb_dim * cnn_kernel_size
    params = {
        "conv_w": jax.random.normal(k_w, (dim, emb_dim, cnn_kernel_size), jnp.float32)
                  * (1.0 / jnp.sqrt(fan_in)),
        "conv_b": jax.random.normal(k_b, (dim,), jnp.float32) * 0.01,
        "cls":    jax.random.normal(k_cls, (dim,), jnp.float32),
        "pos":    jax.random.normal(k_pos, (1, num_patches + 1, dim), jnp.float32),
    }

    out, ps = seq_embedder_forward(seq, params,
                                   cnn_kernel_size=cnn_kernel_size,
                                   stride=stride, token_size=token_size)
    out = jax.block_until_ready(out)

    ref = _reference(seq, params, cnn_kernel_size=cnn_kernel_size,
                     stride=stride, token_size=token_size)
    assert out.shape == (B, num_patches + 1, dim), out.shape
    assert jnp.allclose(out, ref, atol=1e-3, rtol=1e-3), "mismatch vs reference"
    print("KERNEL_OK")
</pallas_src>

<mosaic_0001>
module attributes {stable_mosaic.version = 11 : i64} {
  func.func @_seq_embedder_kernel(%arg0: i32, %arg1: memref<1x64x128xbf16, #tpu.memory_space<vmem>>, %arg2: memref<128x128xbf16, #tpu.memory_space<vmem>>, %arg3: memref<1x128xf32, #tpu.memory_space<vmem>>, %arg4: memref<1x128xf32, #tpu.memory_space<vmem>>, %arg5: memref<8x128xf32, #tpu.memory_space<vmem>>, %arg6: memref<2x9x128xf32, #tpu.memory_space<vmem>>) attributes {dimension_semantics = [#tpu.dimension_semantics<parallel>], iteration_bounds = array<i64: 1>, scalar_prefetch = 0 : i64, scratch_operands = 0 : i64, tpu.core_type = #tpu.core_type<tc>, window_params = [{transform_indices = @transform_0, window_bounds = array<i64: 1, 64, 128>}, {pipeline_mode = #tpu.pipeline_mode<synchronous>, transform_indices = @transform_1, window_bounds = array<i64: 128, 128>}, {pipeline_mode = #tpu.pipeline_mode<synchronous>, transform_indices = @transform_2, window_bounds = array<i64: 1, 128>}, {pipeline_mode = #tpu.pipeline_mode<synchronous>, transform_indices = @transform_3, window_bounds = array<i64: 1, 128>}, {pipeline_mode = #tpu.pipeline_mode<synchronous>, transform_indices = @transform_4, window_bounds = array<i64: 8, 128>}, {transform_indices = @transform_5, window_bounds = array<i64: 2, 9, 128>}]} {
    %c0 = arith.constant 0 : index
    %c0_0 = arith.constant 0 : index
    %c0_1 = arith.constant 0 : index
    %0 = vector.load %arg1[%c0, %c0_0, %c0_1] : memref<1x64x128xbf16, #tpu.memory_space<vmem>>, vector<1x64x128xbf16>
    %1 = vector.shape_cast %0 : vector<1x64x128xbf16> to vector<64x128xbf16>
    %c0_2 = arith.constant 0 : index
    %c0_3 = arith.constant 0 : index
    %2 = vector.load %arg2[%c0_2, %c0_3] : memref<128x128xbf16, #tpu.memory_space<vmem>>, vector<128x128xbf16>
    %cst = arith.constant dense<0.000000e+00> : vector<64x128xf32>
    %3 = tpu.matmul %1, %2, %cst {dimension_numbers = #tpu.dot_dimension_numbers<[1], [0], [0], [1], [0, 0, 1, 1], [], []>} : vector<64x128xbf16>, vector<128x128xbf16>, vector<64x128xf32> -> vector<64x128xf32>
    %4 = vector.extract_strided_slice %3 {offsets = [0, 0], sizes = [16, 128], strides = [1, 1]} : vector<64x128xf32> to vector<16x128xf32>
    %5 = vector.extract_strided_slice %3 {offsets = [16, 0], sizes = [16, 128], strides = [1, 1]} : vector<64x128xf32> to vector<16x128xf32>
    %6 = arith.maximumf %4, %5 : vector<16x128xf32>
    %7 = vector.extract_strided_slice %3 {offsets = [32, 0], sizes = [16, 128], strides = [1, 1]} : vector<64x128xf32> to vector<16x128xf32>
    %8 = arith.maximumf %6, %7 : vector<16x128xf32>
    %9 = vector.extract_strided_slice %3 {offsets = [48, 0], sizes = [16, 128], strides = [1, 1]} : vector<64x128xf32> to vector<16x128xf32>
    %10 = arith.maximumf %8, %9 : vector<16x128xf32>
    %c0_4 = arith.constant 0 : index
    %c0_5 = arith.constant 0 : index
    %11 = vector.load %arg3[%c0_4, %c0_5] : memref<1x128xf32, #tpu.memory_space<vmem>>, vector<1x128xf32>
    %12 = vector.broadcast %11 : vector<1x128xf32> to vector<16x128xf32>
    %13 = arith.addf %10, %12 : vector<16x128xf32>
    %cst_6 = arith.constant 0.000000e+00 : f32
    %14 = vector.broadcast %cst_6 : f32 to vector<16x128xf32>
    %15 = arith.maximumf %13, %14 : vector<16x128xf32>
    %c0_7 = arith.constant 0 : index
    %c0_8 = arith.constant 0 : index
    %16 = vector.load %arg4[%c0_7, %c0_8] : memref<1x128xf32, #tpu.memory_space<vmem>>, vector<1x128xf32>
    %17 = vector.shape_cast %16 : vector<1x128xf32> to vector<1x1x128xf32>
    %18 = vector.shape_cast %17 : vector<1x1x128xf32> to vector<1x1x128xf32>
    %19 = vector.broadcast %18 : vector<1x1x128xf32> to vector<2x1x128xf32>
    %c0_9 = arith.constant 0 : index
    %c0_10 = arith.constant 0 : index
    %c0_11 = arith.constant 0 : index
    %20 = vector.load %arg6[%c0_9, %c0_10, %c0_11] : memref<2x9x128xf32, #tpu.memory_space<vmem>>, vector<2x1x128xf32>
    tpu.vector_store %arg6[%c0_9, %c0_10, %c0_11], %19 {strides = array<i32>} : memref<2x9x128xf32, #tpu.memory_space<vmem>>, vector<2x1x128xf32>,
    %21 = vector.shape_cast %15 : vector<16x128xf32> to vector<2x8x128xf32>
    %c0_12 = arith.constant 0 : index
    %c0_13 = arith.constant 0 : index
    %22 = vector.load %arg5[%c0_12, %c0_13] : memref<8x128xf32, #tpu.memory_space<vmem>>, vector<8x128xf32>
    %23 = vector.shape_cast %22 : vector<8x128xf32> to vector<1x8x128xf32>
    %24 = vector.broadcast %23 : vector<1x8x128xf32> to vector<2x8x128xf32>
    %25 = arith.addf %21, %24 : vector<2x8x128xf32>
    %c0_14 = arith.constant 0 : index
    %c1 = arith.constant 1 : index
    %c0_15 = arith.constant 0 : index
    %26 = vector.load %arg6[%c0_14, %c1, %c0_15] : memref<2x9x128xf32, #tpu.memory_space<vmem>>, vector<2x8x128xf32>
    tpu.vector_store %arg6[%c0_14, %c1, %c0_15], %25 {strides = array<i32>} : memref<2x9x128xf32, #tpu.memory_space<vmem>>, vector<2x8x128xf32>,
    return
  }
  func.func @transform_0(%arg0: i32) -> (i32, i32, i32) {
    %c0_i32 = arith.constant 0 : i32
    %c0_i32_0 = arith.constant 0 : i32
    %c0_i32_1 = arith.constant 0 : i32
    return %arg0, %c0_i32, %c0_i32_0 : i32, i32, i32
  }
  func.func @transform_1(%arg0: i32) -> (i32, i32) {
    %c0_i32 = arith.constant 0 : i32
    %c0_i32_0 = arith.constant 0 : i32
    %c0_i32_1 = arith.constant 0 : i32
    return %c0_i32, %c0_i32_0 : i32, i32
  }
  func.func @transform_2(%arg0: i32) -> (i32, i32) {
    %c0_i32 = arith.constant 0 : i32
    %c0_i32_0 = arith.constant 0 : i32
    %c0_i32_1 = arith.constant 0 : i32
    return %c0_i32, %c0_i32_0 : i32, i32
  }
  func.func @transform_3(%arg0: i32) -> (i32, i32) {
    %c0_i32 = arith.constant 0 : i32
    %c0_i32_0 = arith.constant 0 : i32
    %c0_i32_1 = arith.constant 0 : i32
    return %c0_i32, %c0_i32_0 : i32, i32
  }
  func.func @transform_4(%arg0: i32) -> (i32, i32) {
    %c0_i32 = arith.constant 0 : i32
    %c0_i32_0 = arith.constant 0 : i32
    %c0_i32_1 = arith.constant 0 : i32
    return %c0_i32, %c0_i32_0 : i32, i32
  }
  func.func @transform_5(%arg0: i32) -> (i32, i32, i32) {
    %c0_i32 = arith.constant 0 : i32
    %c0_i32_0 = arith.constant 0 : i32
    %c0_i32_1 = arith.constant 0 : i32
    return %arg0, %c0_i32, %c0_i32_0 : i32, i32, i32
  }
}

</mosaic_0001>

<bundles_post_ra>
// kernel: tpu_custom_call.1
= control target key start
LH: loop header
LB: loop body
LE: loop exit
PB: predicated region body
PF: predicated region fallthrough
CT: control target
= control target key end

     0   :  { %10 = vsyncpa [#allocation3], 0  ;;  %s449_s0 = inlined_call_operand.hbm [shape: bf16[1,64,128], index: 0, kind: input, shape index: {}]   ;;  %s450_s1 = inlined_call_operand.hbm [shape: bf16[128,128], index: 1, kind: input, shape index: {}]   ;;  %s451_s2 = inlined_call_operand.vmem [shape: f32[1,128], index: 2, kind: input, shape index: {}]   ;;  %s452_s3 = inlined_call_operand.vmem [shape: f32[1,128], index: 3, kind: input, shape index: {}]   ;;  %s453_s4 = inlined_call_operand.vmem [shape: f32[8,128], index: 4, kind: input, shape index: {}]   ;;  %s454_s5 = inlined_call_operand.vmem [shape: f32[2,9,128], index: 5, kind: output, shape index: {}]  }
   0x1   :  { %11 = vsyncpa [#allocation5], 0  ;;  %s370_s18 = smov [#allocation2]   ;;  %s322_s22 = scalar_lea.hbm %s449_s0, 512 }
   0x2   :  { %s17_s19 = sshll.u32 %s370_s18, 4  ;;  %p323_p0 = scmp.ne.s32.totalorder %s449_s0, %s322_s22  ;;  %s18_s19 = int_to_ptr.vmem [resolvable:$true] %s17_s19 }
   0x3   :  { %p326_p1 = scmp.lt.u32.totalorder %s322_s22, %s449_s0 }
   0x5   :  { %p328_p2 = pnand %p326_p1, %p323_p0 }
   0x7   :  { %331 = shalt.err (!%p328_p2)
}
   0x8   :  { %s332_s27 = scalar_lea.vmem %s18_s19, 512  ;;  %p337_p4 = scmp.lt.s32.totalorder %s18_s19, %s18_s19 }
   0x9   :  { %p333_p3 = scmp.ne.s32.totalorder %s18_s19, %s332_s27  ;;  %p338_p5 = scmp.lt.s32.totalorder %s332_s27, %s332_s27 }
   0xb   :  { %p339_p6 = por %p338_p5, %p337_p4 }
   0xd   :  { %p340_p7 = pnand %p339_p6, %p333_p3 }
   0xf   :  { %343 = shalt.err (!%p340_p7)
}
  0x10   :  { %s371_s28 = smov 64   ;;  %s372_s29 = smov 4  }
  0x11   :  { %23 = dma.hbm_to_vmem [thread:$0]  %s449_s0, 512, %s18_s19, [#allocation3], %s371_s28, %s371_s28, %s372_s29  }
  0x12   :  { %s373_s7 = smov [#allocation4]   ;;  %s344_s11 = scalar_lea.hbm %s450_s1, 1024 }
  0x13   :  { %s29_s8 = sshll.u32 %s373_s7, 4  ;;  %p345_p8 = scmp.ne.s32.totalorder %s450_s1, %s344_s11  ;;  %s30_s8 = int_to_ptr.vmem [resolvable:$true] %s29_s8 }
  0x14   :  { %p348_p9 = scmp.lt.u32.totalorder %s344_s11, %s450_s1 }
  0x16   :  { %p350_p10 = pnand %p348_p9, %p345_p8 }
  0x18   :  { %353 = shalt.err (!%p350_p10)
}
  0x19   :  { %s354_s16 = scalar_lea.vmem %s30_s8, 1024  ;;  %p359_p12 = scmp.lt.s32.totalorder %s30_s8, %s30_s8 }
  0x1a   :  { %p355_p11 = scmp.ne.s32.totalorder %s30_s8, %s354_s16  ;;  %p360_p13 = scmp.lt.s32.totalorder %s354_s16, %s354_s16 }
  0x1c   :  { %p361_p0 = por %p360_p13, %p359_p12 }
  0x1e   :  { %p362_p1 = pnand %p361_p0, %p355_p11 }
  0x20   :  { %365 = shalt.err (!%p362_p1)
}
  0x21   :  { %35 = dma.hbm_to_vmem [thread:$0]  %s450_s1, 1024, %s30_s8, [#allocation5], %s371_s28, %s371_s28, %s372_s29  }
  0x22   :  { %366 = dma.done.wait [#allocation3], 512  }
  0x23   :  { %367 = vsyncadd [#allocation3], 4294966784 }
  0x24   :  { %368 = dma.done.wait [#allocation5], 1024  }
  0x25   :  { %369 = vsyncadd [#allocation5], 4294966272  ;;  %v227_v0 = vld [vmem:[%s452_s3] sm:$0x1]  ;;  %v311_v2 = vld [vmem:[#allocation4 + $0x8] sm:$0xff]  }
  0x26   :  { %228 = vst [vmem:[%s454_s5] sm:$0x1] %v227_v0  ;;  %229 = vst [vmem:[%s454_s5 + $0x10] sm:$0x1] %v227_v0  ;;  %v310_v1 = vld [vmem:[#allocation4] sm:$0xff]   ;;  %v312_v3 = vld [vmem:[#allocation4 + $0x10] sm:$0xff]  }
  0x27   :  { %266 = vmatprep.subr.bf16.mxu0 %v310_v1  ;;  %290 = vmatprep.subr.bf16.mxu1 %v310_v1  ;;  %v313_v4 = vld [vmem:[#allocation4 + $0x18] sm:$0xff]   ;;  %v318_v5 = vld [vmem:[#allocation2] sm:$0xff]   ;;  %v319_v6 = vld [vmem:[#allocation2 + $0x10] sm:$0xff]  }
  0x28   :  { %267 = vmatpush3.bf16.msra.mxu0 %v310_v1  ;;  %298 = vmatpush3.bf16.msra.mxu1 %v310_v1  ;;  %v314_v7 = vld [vmem:[#allocation4 + $0x20] sm:$0xff]   ;;  %v315_v8 = vld [vmem:[#allocation4 + $0x28] sm:$0xff]   ;;  %v316_v9 = vld [vmem:[#allocation4 + $0x30] sm:$0xff]  }
  0x29   :  { %268 = vmatprep.subr.bf16.mxu0 %v311_v2  ;;  %291 = vmatprep.subr.bf16.mxu1 %v311_v2  ;;  %v317_v10 = vld [vmem:[#allocation4 + $0x38] sm:$0xff]   ;;  %v320_v11 = vld [vmem:[#allocation2 + $0x8] sm:$0xff]   ;;  %v253_v24 = vld [vmem:[%s451_s2] ss:$0 sm:$0xff] }
  0x2a   :  { %282 = vmatprep.mubr.bf16.mxu0 %v318_v5  ;;  %286 = vmatprep.mubr.bf16.mxu1 %v319_v6  ;;  %v321_v12 = vld [vmem:[#allocation2 + $0x18] sm:$0xff]   ;;  %v230_v29 = vld [vmem:[%s453_s4] sm:$0xff] }
  0x2c   :  { %269 = vmatpush3.bf16.msra.mxu0 %v311_v2  ;;  %299 = vmatpush3.bf16.msra.mxu1 %v311_v2 }
  0x2d   :  { %270 = vmatprep.subr.bf16.mxu0 %v312_v3  ;;  %292 = vmatprep.subr.bf16.mxu1 %v312_v3 }
  0x30   :  { %271 = vmatpush3.bf16.msra.mxu0 %v312_v3  ;;  %300 = vmatpush3.bf16.msra.mxu1 %v312_v3 }
  0x31   :  { %272 = vmatprep.subr.bf16.mxu0 %v313_v4  ;;  %293 = vmatprep.subr.bf16.mxu1 %v313_v4 }
  0x34   :  { %273 = vmatpush3.bf16.msra.mxu0 %v313_v4  ;;  %301 = vmatpush3.bf16.msra.mxu1 %v313_v4 }
  0x35   :  { %274 = vmatprep.subr.bf16.mxu0 %v314_v7  ;;  %294 = vmatprep.subr.bf16.mxu1 %v314_v7 }
  0x38   :  { %275 = vmatpush3.bf16.msra.mxu0 %v314_v7  ;;  %302 = vmatpush3.bf16.msra.mxu1 %v314_v7 }
  0x39   :  { %276 = vmatprep.subr.bf16.mxu0 %v315_v8  ;;  %295 = vmatprep.subr.bf16.mxu1 %v315_v8 }
  0x3c   :  { %277 = vmatpush3.bf16.msra.mxu0 %v315_v8  ;;  %303 = vmatpush3.bf16.msra.mxu1 %v315_v8 }
  0x3d   :  { %278 = vmatprep.subr.bf16.mxu0 %v316_v9  ;;  %296 = vmatprep.subr.bf16.mxu1 %v316_v9 }
  0x40   :  { %279 = vmatpush3.bf16.msra.mxu0 %v316_v9  ;;  %304 = vmatpush3.bf16.msra.mxu1 %v316_v9 }
  0x41   :  { %280 = vmatprep.subr.bf16.mxu0 %v317_v10  ;;  %297 = vmatprep.subr.bf16.mxu1 %v317_v10 }
  0x44   :  { %281 = vmatpush3.bf16.msra.mxu0 %v317_v10  ;;  %305 = vmatpush3.bf16.msra.mxu1 %v317_v10 }
  0x47   :  { %283 = vmatmul.mubr.bf16.vlgmr.msra.gmra.mrb[0].mxu0 %v320_v11  ;;  %287 = vmatmul.mubr.bf16.vlgmr.msra.gmra.mrb[0].mxu1 %v321_v12 }
 0x11a   :  { %v284_v13 = vpop.f32.mrb[0].mxu0  ;;  %v288_v14 = vpop.f32.mrb[0].mxu1 }
 0x11b   :  { %v179_v15 = vpop.f32.mrb[1].mxu0  ;;  %v195_v16 = vpop.f32.mrb[1].mxu1 }
 0x11c   :  { %v210_v17 = vmax.f32 %v179_v15, %v284_v13  ;;  %v285_v18 = vpop.f32.mrb[2].mxu0  ;;  %v289_v19 = vpop.f32.mrb[2].mxu1 }
 0x11d   :  { %v182_v20 = vpop.f32.mrb[3].mxu0  ;;  %v198_v21 = vpop.f32.mrb[3].mxu1 }
 0x11e   :  { %v212_v22 = vmax.f32 %v210_v17, %v195_v16  ;;  %v211_v23 = vmax.f32 %v182_v20, %v285_v18 }
 0x120   :  { %v214_v25 = vmax.f32 %v212_v22, %v288_v14  ;;  %v213_v26 = vmax.f32 %v211_v23, %v198_v21 }
 0x122   :  { %v223_v27 = vadd.f32 %v253_v24, %v214_v25  ;;  %v215_v28 = vmax.f32 %v213_v26, %v289_v19 }
 0x124   :  { %v225_v30 = vmax.f32 %v223_v27, 0.0  ;;  %v224_v31 = vadd.f32 %v253_v24, %v215_v28 }
 0x126   :  { %v231_v32 = vadd.f32 %v230_v29, %v225_v30  ;;  %v226_v33 = vmax.f32 %v224_v31, 0.0 }
 0x128   :  { %233 = vst [vmem:[%s454_s5 + $0x1] sm:$0xff] %v231_v32  ;;  %v232_v34 = vadd.f32 %v230_v29, %v226_v33 }
 0x12a   :  { %234 = vst [vmem:[%s454_s5 + $0x11] sm:$0xff] %v232_v34 }
 0x12b   :  { %239 = vsyncpa [#allocation3], 1 }
 0x12c   :  { %240 = vsyncpa [#allocation5], 1 }

</bundles_post_ra>
